<compile_context>
chip_gen: v7x
topology: tpu7x:2x2x1
jax: 0.10.0
libtpu: 0.0.40
codegen_flags: <defaults>
</compile_context>

<pallas_src>
import jax
import jax.numpy as jnp
from jax.experimental import pallas as pl
from jax.experimental.pallas import tpu as pltpu

EPS = 1e-5  # PyTorch LayerNorm default eps


def _ltsa_kernel(x_ref, mask_ref, scale_ref, shift_ref,
                 g1_ref, b1_ref, wqkv_ref, bqkv_ref, hm_ref,
                 g2_ref, b2_ref, wo_ref, bo_ref,
                 o_ref):
    f32 = jnp.float32
    bf16 = jnp.bfloat16

    x = x_ref[0]                          # (T, D) f32
    T, D = x.shape
    m = mask_ref[0]                       # (T, 1), 1.0 == masked
    masked = (m == 1.0)

    # ---- LayerNorm (pre-attention), f32 on VPU ----
    mu = jnp.mean(x, axis=-1, keepdims=True)
    var = jnp.mean(jnp.square(x - mu), axis=-1, keepdims=True)
    xn = (x - mu) * jax.lax.rsqrt(var + EPS) * g1_ref[...] + b1_ref[...]

    # ---- fused Q/K/V projection: one (T,D)@(D,3D) bf16 matmul, f32 accumulate ----
    xn_bf = xn.astype(bf16)
    qkv = jnp.dot(xn_bf, wqkv_ref[...], preferred_element_type=f32) + bqkv_ref[...]
    q = qkv[:, :D]
    k = qkv[:, D:2 * D]
    v = qkv[:, 2 * D:]

    k = jnp.where(masked, -jnp.inf, k)    # masked_fill(key, -inf)
    v = jnp.where(masked, 0.0, v)         # masked_fill(value, 0)

    # ---- key softmax over time (dim=1 in torch -> axis 0 here), per feature ----
    k = k - jnp.max(k, axis=0, keepdims=True)
    ek = jnp.exp(k)
    ksm = ek * pl.reciprocal(jnp.sum(ek, axis=0, keepdims=True), approx=True)

    # ---- query softmax over the head-feature dim, without lane slicing ----
    # Full-row max is a valid stabilizer (cancels between numerator and denominator);
    # the per-head denominator is a block-diagonal ones matmul on the MXU.
    q = q - jnp.max(q, axis=-1, keepdims=True)
    eq = jnp.exp(q)                                   # (T, D) f32
    eq_bf = eq.astype(bf16)
    hm = hm_ref[...]                                  # (D, D) f32, 1 iff same head
    denom = jnp.dot(eq_bf, hm.astype(bf16), preferred_element_type=f32)   # (T, D)

    # ---- linear attention ----
    # att[d, e] = sum_t ksm[t, d] * v[t, e], restricted to per-head blocks
    att = jnp.einsum('td,te->de', ksm.astype(bf16), v.astype(bf16),
                     preferred_element_type=f32)      # (D, D)
    att = att * hm                                    # keep only block-diagonal (per-head)
    # y[t, e] = (sum_d eq[t, d] * att[e, d]) / denom[t, e]   == softmax(q) @ att^T per head
    y = jnp.einsum('td,ed->te', eq_bf, att.astype(bf16),
                   preferred_element_type=f32)
    y = y * pl.reciprocal(denom, approx=True)         # (T, D)

    # ---- StylizationBlock (emb projection hoisted; scale/shift passed in) ----
    mu2 = jnp.mean(y, axis=-1, keepdims=True)
    var2 = jnp.mean(jnp.square(y - mu2), axis=-1, keepdims=True)
    yn = (y - mu2) * jax.lax.rsqrt(var2 + EPS) * g2_ref[...] + b2_ref[...]
    h = yn * (1.0 + scale_ref[0]) + shift_ref[0]
    h = h * jax.nn.sigmoid(h)                          # SiLU (Dropout == identity in eval)
    out = jnp.dot(h.astype(bf16), wo_ref[...], preferred_element_type=f32) + bo_ref[...]

    o_ref[0] = x + out                                 # residual


def _vmem_limit_bytes(T, D):
    """Conservative scoped-VMEM budget: pipelined I/O + weights + temporaries + headroom."""
    f32, bf16 = 4, 2
    io_blocks = 2 * 2 * (T * D * f32)                       # x in + out, double-buffered
    small_in = 2 * 2 * (T + 2 * D) * f32                    # mask / scale / shift
    weights = 2 * ((3 * D * D + D * D) * bf16 + (D * D + 10 * D) * f32)
    temps = 10 * T * D * f32 + 3 * D * D * f32              # qkv/eq/att/mask temporaries
    need = io_blocks + small_in + weights + temps
    return int(min(max(2 * need, 8 << 20), 32 << 20))


def linear_temporal_self_attention(x, emb, src_mask, params, num_head):
    B, T, D = x.shape
    hd = D // num_head

    x = x.astype(jnp.float32)
    mask3 = src_mask.astype(jnp.float32).reshape(B, T, 1)

    # Hoisted StylizationBlock emb path: one well-shaped batched matmul in XLA.
    e = emb.astype(jnp.float32)
    e = e * jax.nn.sigmoid(e)                                # SiLU
    eo = e @ params['we'] + params['be']                     # (B, 2D)
    scale = eo[:, :D].reshape(B, 1, D)
    shift = eo[:, D:].reshape(B, 1, D)

    # Fused QKV weight (bf16) + bias; bf16 output projection weight.
    wqkv = jnp.concatenate(
        [params['wq'], params['wk'], params['wv']], axis=1).astype(jnp.bfloat16)   # (D, 3D)
    bqkv = jnp.concatenate([params['bq'], params['bk'], params['bv']], axis=1)     # (1, 3D)
    wo = params['wo'].astype(jnp.bfloat16)

    # Block-diagonal "same head" mask (D, D): 1.0 iff column/row belong to the same head.
    head_ids = jnp.arange(D) // hd
    head_mask = (head_ids[:, None] == head_ids[None, :]).astype(jnp.float32)

    weight_args = (params['g1'], params['b1'], wqkv, bqkv, head_mask,
                   params['g2'], params['b2'], wo, params['bo'])

    def batch_spec(shape):
        return pl.BlockSpec(shape, lambda b: (b,) + (0,) * (len(shape) - 1))

    def shared_spec(shape):
        return pl.BlockSpec(shape, lambda b: (0,) * len(shape))

    return pl.pallas_call(
        _ltsa_kernel,
        out_shape=jax.ShapeDtypeStruct((B, T, D), jnp.float32),
        grid=(B,),
        in_specs=[batch_spec((1, T, D)),      # x
                  batch_spec((1, T, 1)),      # src_mask
                  batch_spec((1, 1, D)),      # scale
                  batch_spec((1, 1, D)),      # shift
                  *[shared_spec(w.shape) for w in weight_args]],
        out_specs=batch_spec((1, T, D)),
        compiler_params=pltpu.CompilerParams(
            dimension_semantics=("parallel",),
            vmem_limit_bytes=_vmem_limit_bytes(T, D)),
    )(x, mask3, scale, shift, *weight_args)


def ref_forward(x, emb, src_mask, p, H):
    """Plain-JAX reference reproducing the PyTorch forward (eval mode), all f32."""
    B, T, D = x.shape
    mu = x.mean(-1, keepdims=True)
    var = ((x - mu) ** 2).mean(-1, keepdims=True)
    xn = (x - mu) / jnp.sqrt(var + EPS) * p['g1'] + p['b1']
    q = xn @ p['wq'] + p['bq']
    k = xn @ p['wk'] + p['bk']
    v = xn @ p['wv'] + p['bv']
    mask = (src_mask == 1)[..., None]
    k = jnp.where(mask, -jnp.inf, k)
    v = jnp.where(mask, 0.0, v)
    hd = D // H
    qh = q.reshape(B, T, H, hd).transpose(0, 2, 1, 3)
    kh = k.reshape(B, T, H, hd).transpose(0, 2, 1, 3)
    vh = v.reshape(B, T, H, hd).transpose(0, 2, 1, 3)
    qh = jax.nn.softmax(qh, axis=-1)
    kh = jax.nn.softmax(kh, axis=2)
    att = jnp.einsum('bhtd,bhte->bhde', kh, vh)
    y = jnp.einsum('bhtd,bhed->bhte', qh, att)
    y = y.transpose(0, 2, 1, 3).reshape(B, T, D)
    e = emb * jax.nn.sigmoid(emb)
    eo = e @ p['we'] + p['be']
    scale = eo[:, :D][:, None, :]
    shift = eo[:, D:][:, None, :]
    mu2 = y.mean(-1, keepdims=True)
    var2 = ((y - mu2) ** 2).mean(-1, keepdims=True)
    yn = (y - mu2) / jnp.sqrt(var2 + EPS) * p['g2'] + p['b2']
    h = yn * (1.0 + scale) + shift
    h = h * jax.nn.sigmoid(h)
    out = h @ p['wo'] + p['bo']
    return x + out


def make_params(key, latent_dim, time_embed_dim):
    D, E = latent_dim, time_embed_dim
    ks = jax.random.split(key, 8)
    s = 0.05
    return {
        'g1': jnp.ones((1, D), jnp.float32),
        'b1': jnp.zeros((1, D), jnp.float32),
        'wq': s * jax.random.normal(ks[0], (D, D), jnp.float32),
        'bq': s * jax.random.normal(ks[1], (1, D), jnp.float32),
        'wk': s * jax.random.normal(ks[2], (D, D), jnp.float32),
        'bk': s * jax.random.normal(ks[3], (1, D), jnp.float32),
        'wv': s * jax.random.normal(ks[4], (D, D), jnp.float32),
        'bv': s * jax.random.normal(ks[5], (1, D), jnp.float32),
        # StylizationBlock
        'we': s * jax.random.normal(ks[6], (E, 2 * D), jnp.float32),
        'be': jnp.zeros((1, 2 * D), jnp.float32),
        'g2': jnp.ones((1, D), jnp.float32),
        'b2': jnp.zeros((1, D), jnp.float32),
        # original code zero-inits this Linear; nonzero here to exercise the path
        'wo': s * jax.random.normal(ks[7], (D, D), jnp.float32),
        'bo': jnp.zeros((1, D), jnp.float32),
    }


if __name__ == "__main__":
    # D=128 keeps every matmul / store lane-dense (full 128-lane width).
    B, T, D, H, E = 2, 16, 128, 4, 64

    key = jax.random.PRNGKey(0)
    kx, ke, kp = jax.random.split(key, 3)
    x = jax.random.normal(kx, (B, T, D), jnp.float32)
    emb = jax.random.normal(ke, (B, E), jnp.float32)
    # 1 == masked, 0 == valid (last three timesteps masked)
    src_mask = jnp.concatenate(
        [jnp.zeros((B, T - 3), jnp.float32), jnp.ones((B, 3), jnp.float32)], axis=1)

    params = make_params(kp, D, E)

    y = linear_temporal_self_attention(x, emb, src_mask, params, H)
    y = jax.block_until_ready(y)

    y_ref = ref_forward(x, emb, src_mask, params, H)
    max_err = float(jnp.max(jnp.abs(y - y_ref)))
    # bf16 MXU operands + approx reciprocals -> slightly looser tolerance than f32
    assert jnp.allclose(y, y_ref, rtol=5e-2, atol=5e-2), f"mismatch vs reference (max abs err {max_err})"

    print("KERNEL_OK")
</pallas_src>

<mosaic_0001>
module attributes {stable_mosaic.version = 11 : i64} {
  func.func @_ltsa_kernel(%arg0: i32, %arg1: memref<1x16x128xf32, #tpu.memory_space<vmem>>, %arg2: memref<1x16x1xf32, #tpu.memory_space<vmem>>, %arg3: memref<1x1x128xf32, #tpu.memory_space<vmem>>, %arg4: memref<1x1x128xf32, #tpu.memory_space<vmem>>, %arg5: memref<1x128xf32, #tpu.memory_space<vmem>>, %arg6: memref<1x128xf32, #tpu.memory_space<vmem>>, %arg7: memref<128x384xbf16, #tpu.memory_space<vmem>>, %arg8: memref<1x384xf32, #tpu.memory_space<vmem>>, %arg9: memref<128x128xf32, #tpu.memory_space<vmem>>, %arg10: memref<1x128xf32, #tpu.memory_space<vmem>>, %arg11: memref<1x128xf32, #tpu.memory_space<vmem>>, %arg12: memref<128x128xbf16, #tpu.memory_space<vmem>>, %arg13: memref<1x128xf32, #tpu.memory_space<vmem>>, %arg14: memref<1x16x128xf32, #tpu.memory_space<vmem>>) attributes {dimension_semantics = [#tpu.dimension_semantics<parallel>], iteration_bounds = array<i64: 2>, scalar_prefetch = 0 : i64, scratch_operands = 0 : i64, tpu.core_type = #tpu.core_type<tc>, window_params = [{transform_indices = @transform_0, window_bounds = array<i64: 1, 16, 128>}, {transform_indices = @transform_1, window_bounds = array<i64: 1, 16, 1>}, {transform_indices = @transform_2, window_bounds = array<i64: 1, 1, 128>}, {transform_indices = @transform_3, window_bounds = array<i64: 1, 1, 128>}, {pipeline_mode = #tpu.pipeline_mode<synchronous>, transform_indices = @transform_4, window_bounds = array<i64: 1, 128>}, {pipeline_mode = #tpu.pipeline_mode<synchronous>, transform_indices = @transform_5, window_bounds = array<i64: 1, 128>}, {pipeline_mode = #tpu.pipeline_mode<synchronous>, transform_indices = @transform_6, window_bounds = array<i64: 128, 384>}, {pipeline_mode = #tpu.pipeline_mode<synchronous>, transform_indices = @transform_7, window_bounds = array<i64: 1, 384>}, {pipeline_mode = #tpu.pipeline_mode<synchronous>, transform_indices = @transform_8, window_bounds = array<i64: 128, 128>}, {pipeline_mode = #tpu.pipeline_mode<synchronous>, transform_indices = @transform_9, window_bounds = array<i64: 1, 128>}, {pipeline_mode = #tpu.pipeline_mode<synchronous>, transform_indices = @transform_10, window_bounds = array<i64: 1, 128>}, {pipeline_mode = #tpu.pipeline_mode<synchronous>, transform_indices = @transform_11, window_bounds = array<i64: 128, 128>}, {pipeline_mode = #tpu.pipeline_mode<synchronous>, transform_indices = @transform_12, window_bounds = array<i64: 1, 128>}, {transform_indices = @transform_13, window_bounds = array<i64: 1, 16, 128>}]} {
    %c0 = arith.constant 0 : index
    %c0_0 = arith.constant 0 : index
    %c0_1 = arith.constant 0 : index
    %0 = vector.load %arg1[%c0, %c0_0, %c0_1] : memref<1x16x128xf32, #tpu.memory_space<vmem>>, vector<1x16x128xf32>
    %1 = vector.shape_cast %0 : vector<1x16x128xf32> to vector<16x128xf32>
    %c0_2 = arith.constant 0 : index
    %c0_3 = arith.constant 0 : index
    %c0_4 = arith.constant 0 : index
    %2 = vector.load %arg2[%c0_2, %c0_3, %c0_4] : memref<1x16x1xf32, #tpu.memory_space<vmem>>, vector<1x16x1xf32>
    %3 = vector.shape_cast %2 : vector<1x16x1xf32> to vector<16x1xf32>
    %cst = arith.constant 1.000000e+00 : f32
    %4 = vector.broadcast %cst : f32 to vector<16x1xf32>
    %5 = arith.cmpf oeq, %3, %4 : vector<16x1xf32>
    %cst_5 = arith.constant dense<0.000000e+00> : vector<16xf32>
    %6 = vector.multi_reduction <add>, %1, %cst_5 [1] : vector<16x128xf32> to vector<16xf32>
    %7 = vector.shape_cast %6 : vector<16xf32> to vector<16x1xf32>
    %cst_6 = arith.constant 1.280000e+02 : f32
    %8 = vector.broadcast %cst_6 : f32 to vector<16x1xf32>
    %9 = arith.divf %7, %8 : vector<16x1xf32>
    %10 = vector.broadcast %9 : vector<16x1xf32> to vector<16x128xf32>
    %11 = arith.subf %1, %10 : vector<16x128xf32>
    %12 = arith.mulf %11, %11 : vector<16x128xf32>
    %cst_7 = arith.constant dense<0.000000e+00> : vector<16xf32>
    %13 = vector.multi_reduction <add>, %12, %cst_7 [1] : vector<16x128xf32> to vector<16xf32>
    %14 = vector.shape_cast %13 : vector<16xf32> to vector<16x1xf32>
    %cst_8 = arith.constant 1.280000e+02 : f32
    %15 = vector.broadcast %cst_8 : f32 to vector<16x1xf32>
    %16 = arith.divf %14, %15 : vector<16x1xf32>
    %17 = vector.broadcast %9 : vector<16x1xf32> to vector<16x128xf32>
    %18 = arith.subf %1, %17 : vector<16x128xf32>
    %cst_9 = arith.constant 9.99999974E-6 : f32
    %19 = vector.broadcast %cst_9 : f32 to vector<16x1xf32>
    %20 = arith.addf %16, %19 : vector<16x1xf32>
    %21 = math.rsqrt %20 : vector<16x1xf32>
    %22 = vector.broadcast %21 : vector<16x1xf32> to vector<16x128xf32>
    %23 = arith.mulf %18, %22 : vector<16x128xf32>
    %c0_10 = arith.constant 0 : index
    %c0_11 = arith.constant 0 : index
    %24 = vector.load %arg5[%c0_10, %c0_11] : memref<1x128xf32, #tpu.memory_space<vmem>>, vector<1x128xf32>
    %25 = vector.broadcast %24 : vector<1x128xf32> to vector<16x128xf32>
    %26 = arith.mulf %23, %25 : vector<16x128xf32>
    %c0_12 = arith.constant 0 : index
    %c0_13 = arith.constant 0 : index
    %27 = vector.load %arg6[%c0_12, %c0_13] : memref<1x128xf32, #tpu.memory_space<vmem>>, vector<1x128xf32>
    %28 = vector.broadcast %27 : vector<1x128xf32> to vector<16x128xf32>
    %29 = arith.addf %26, %28 : vector<16x128xf32>
    %30 = arith.truncf %29 : vector<16x128xf32> to vector<16x128xbf16>
    %c0_14 = arith.constant 0 : index
    %c0_15 = arith.constant 0 : index
    %31 = vector.load %arg7[%c0_14, %c0_15] : memref<128x384xbf16, #tpu.memory_space<vmem>>, vector<128x384xbf16>
    %cst_16 = arith.constant dense<0.000000e+00> : vector<16x384xf32>
    %32 = tpu.matmul %30, %31, %cst_16 {dimension_numbers = #tpu.dot_dimension_numbers<[1], [0], [0], [1], [0, 0, 1, 1], [], []>} : vector<16x128xbf16>, vector<128x384xbf16>, vector<16x384xf32> -> vector<16x384xf32>
    %c0_17 = arith.constant 0 : index
    %c0_18 = arith.constant 0 : index
    %33 = vector.load %arg8[%c0_17, %c0_18] : memref<1x384xf32, #tpu.memory_space<vmem>>, vector<1x384xf32>
    %34 = vector.broadcast %33 : vector<1x384xf32> to vector<16x384xf32>
    %35 = arith.addf %32, %34 : vector<16x384xf32>
    %36 = vector.extract_strided_slice %35 {offsets = [0, 0], sizes = [16, 128], strides = [1, 1]} : vector<16x384xf32> to vector<16x128xf32>
    %37 = vector.extract_strided_slice %35 {offsets = [0, 128], sizes = [16, 128], strides = [1, 1]} : vector<16x384xf32> to vector<16x128xf32>
    %38 = vector.extract_strided_slice %35 {offsets = [0, 256], sizes = [16, 128], strides = [1, 1]} : vector<16x384xf32> to vector<16x128xf32>
    %cst_19 = arith.constant 0xFF800000 : f32
    %39 = vector.shape_cast %5 : vector<16x1xi1> to vector<16x1xi1>
    %40 = vector.broadcast %39 : vector<16x1xi1> to vector<16x128xi1>
    %41 = vector.broadcast %cst_19 : f32 to vector<16x128xf32>
    %42 = arith.select %40, %41, %37 : vector<16x128xi1>, vector<16x128xf32>
    %cst_20 = arith.constant 0.000000e+00 : f32
    %43 = vector.shape_cast %5 : vector<16x1xi1> to vector<16x1xi1>
    %44 = vector.broadcast %43 : vector<16x1xi1> to vector<16x128xi1>
    %45 = vector.broadcast %cst_20 : f32 to vector<16x128xf32>
    %46 = arith.select %44, %45, %38 : vector<16x128xi1>, vector<16x128xf32>
    %cst_21 = arith.constant dense<0xFF800000> : vector<128xf32>
    %47 = vector.multi_reduction <maximumf>, %42, %cst_21 [0] : vector<16x128xf32> to vector<128xf32>
    %48 = vector.shape_cast %47 : vector<128xf32> to vector<1x128xf32>
    %49 = vector.broadcast %48 : vector<1x128xf32> to vector<16x128xf32>
    %50 = arith.subf %42, %49 : vector<16x128xf32>
    %51 = math.exp %50 : vector<16x128xf32>
    %cst_22 = arith.constant dense<0.000000e+00> : vector<128xf32>
    %52 = vector.multi_reduction <add>, %51, %cst_22 [0] : vector<16x128xf32> to vector<128xf32>
    %53 = vector.shape_cast %52 : vector<128xf32> to vector<1x128xf32>
    %54 = tpu.reciprocal %53 {approx = true} : vector<1x128xf32> -> vector<1x128xf32>
    %55 = vector.broadcast %54 : vector<1x128xf32> to vector<16x128xf32>
    %56 = arith.mulf %51, %55 : vector<16x128xf32>
    %cst_23 = arith.constant dense<0xFF800000> : vector<16xf32>
    %57 = vector.multi_reduction <maximumf>, %36, %cst_23 [1] : vector<16x128xf32> to vector<16xf32>
    %58 = vector.shape_cast %57 : vector<16xf32> to vector<16x1xf32>
    %59 = vector.broadcast %58 : vector<16x1xf32> to vector<16x128xf32>
    %60 = arith.subf %36, %59 : vector<16x128xf32>
    %61 = math.exp %60 : vector<16x128xf32>
    %62 = arith.truncf %61 : vector<16x128xf32> to vector<16x128xbf16>
    %c0_24 = arith.constant 0 : index
    %c0_25 = arith.constant 0 : index
    %63 = vector.load %arg9[%c0_24, %c0_25] : memref<128x128xf32, #tpu.memory_space<vmem>>, vector<128x128xf32>
    %64 = arith.truncf %63 : vector<128x128xf32> to vector<128x128xbf16>
    %cst_26 = arith.constant dense<0.000000e+00> : vector<16x128xf32>
    %65 = tpu.matmul %62, %64, %cst_26 {dimension_numbers = #tpu.dot_dimension_numbers<[1], [0], [0], [1], [0, 0, 1, 1], [], []>} : vector<16x128xbf16>, vector<128x128xbf16>, vector<16x128xf32> -> vector<16x128xf32>
    %66 = arith.truncf %56 : vector<16x128xf32> to vector<16x128xbf16>
    %67 = arith.truncf %46 : vector<16x128xf32> to vector<16x128xbf16>
    "tpu.trace_start"() <{level = 10 : i32, message = "td,te->de"}> : () -> ()
    %cst_27 = arith.constant dense<0.000000e+00> : vector<128x128xf32>
    %68 = tpu.matmul %66, %67, %cst_27 {dimension_numbers = #tpu.dot_dimension_numbers<[0], [0], [1], [1], [0, 1, 1, 1], [], []>} : vector<16x128xbf16>, vector<16x128xbf16>, vector<128x128xf32> -> vector<128x128xf32>
    "tpu.trace_stop"() : () -> ()
    %69 = arith.mulf %68, %63 : vector<128x128xf32>
    %70 = arith.truncf %69 : vector<128x128xf32> to vector<128x128xbf16>
    "tpu.trace_start"() <{level = 10 : i32, message = "td,ed->te"}> : () -> ()
    %cst_28 = arith.constant dense<0.000000e+00> : vector<16x128xf32>
    %71 = tpu.matmul %62, %70, %cst_28 {dimension_numbers = #tpu.dot_dimension_numbers<[1], [1], [0], [0], [0, 0, 1, 0], [], []>} : vector<16x128xbf16>, vector<128x128xbf16>, vector<16x128xf32> -> vector<16x128xf32>
    "tpu.trace_stop"() : () -> ()
    %72 = tpu.reciprocal %65 {approx = true} : vector<16x128xf32> -> vector<16x128xf32>
    %73 = arith.mulf %71, %72 : vector<16x128xf32>
    %cst_29 = arith.constant dense<0.000000e+00> : vector<16xf32>
    %74 = vector.multi_reduction <add>, %73, %cst_29 [1] : vector<16x128xf32> to vector<16xf32>
    %75 = vector.shape_cast %74 : vector<16xf32> to vector<16x1xf32>
    %cst_30 = arith.constant 1.280000e+02 : f32
    %76 = vector.broadcast %cst_30 : f32 to vector<16x1xf32>
    %77 = arith.divf %75, %76 : vector<16x1xf32>
    %78 = vector.broadcast %77 : vector<16x1xf32> to vector<16x128xf32>
    %79 = arith.subf %73, %78 : vector<16x128xf32>
    %80 = arith.mulf %79, %79 : vector<16x128xf32>
    %cst_31 = arith.constant dense<0.000000e+00> : vector<16xf32>
    %81 = vector.multi_reduction <add>, %80, %cst_31 [1] : vector<16x128xf32> to vector<16xf32>
    %82 = vector.shape_cast %81 : vector<16xf32> to vector<16x1xf32>
    %cst_32 = arith.constant 1.280000e+02 : f32
    %83 = vector.broadcast %cst_32 : f32 to vector<16x1xf32>
    %84 = arith.divf %82, %83 : vector<16x1xf32>
    %85 = vector.broadcast %77 : vector<16x1xf32> to vector<16x128xf32>
    %86 = arith.subf %73, %85 : vector<16x128xf32>
    %cst_33 = arith.constant 9.99999974E-6 : f32
    %87 = vector.broadcast %cst_33 : f32 to vector<16x1xf32>
    %88 = arith.addf %84, %87 : vector<16x1xf32>
    %89 = math.rsqrt %88 : vector<16x1xf32>
    %90 = vector.broadcast %89 : vector<16x1xf32> to vector<16x128xf32>
    %91 = arith.mulf %86, %90 : vector<16x128xf32>
    %c0_34 = arith.constant 0 : index
    %c0_35 = arith.constant 0 : index
    %92 = vector.load %arg10[%c0_34, %c0_35] : memref<1x128xf32, #tpu.memory_space<vmem>>, vector<1x128xf32>
    %93 = vector.broadcast %92 : vector<1x128xf32> to vector<16x128xf32>
    %94 = arith.mulf %91, %93 : vector<16x128xf32>
    %c0_36 = arith.constant 0 : index
    %c0_37 = arith.constant 0 : index
    %95 = vector.load %arg11[%c0_36, %c0_37] : memref<1x128xf32, #tpu.memory_space<vmem>>, vector<1x128xf32>
    %96 = vector.broadcast %95 : vector<1x128xf32> to vector<16x128xf32>
    %97 = arith.addf %94, %96 : vector<16x128xf32>
    %c0_38 = arith.constant 0 : index
    %c0_39 = arith.constant 0 : index
    %c0_40 = arith.constant 0 : index
    %98 = vector.load %arg3[%c0_38, %c0_39, %c0_40] : memref<1x1x128xf32, #tpu.memory_space<vmem>>, vector<1x1x128xf32>
    %99 = vector.shape_cast %98 : vector<1x1x128xf32> to vector<1x128xf32>
    %cst_41 = arith.constant 1.000000e+00 : f32
    %100 = vector.broadcast %cst_41 : f32 to vector<1x128xf32>
    %101 = arith.addf %100, %99 : vector<1x128xf32>
    %102 = vector.broadcast %101 : vector<1x128xf32> to vector<16x128xf32>
    %103 = arith.mulf %97, %102 : vector<16x128xf32>
    %c0_42 = arith.constant 0 : index
    %c0_43 = arith.constant 0 : index
    %c0_44 = arith.constant 0 : index
    %104 = vector.load %arg4[%c0_42, %c0_43, %c0_44] : memref<1x1x128xf32, #tpu.memory_space<vmem>>, vector<1x1x128xf32>
    %105 = vector.shape_cast %104 : vector<1x1x128xf32> to vector<1x128xf32>
    %106 = vector.broadcast %105 : vector<1x128xf32> to vector<16x128xf32>
    %107 = arith.addf %103, %106 : vector<16x128xf32>
    %108 = arith.negf %107 : vector<16x128xf32>
    %109 = math.exp %108 : vector<16x128xf32>
    %cst_45 = arith.constant 1.000000e+00 : f32
    %110 = vector.broadcast %cst_45 : f32 to vector<16x128xf32>
    %111 = arith.addf %110, %109 : vector<16x128xf32>
    %112 = arith.divf %110, %111 : vector<16x128xf32>
    %113 = arith.mulf %107, %112 : vector<16x128xf32>
    %114 = arith.truncf %113 : vector<16x128xf32> to vector<16x128xbf16>
    %c0_46 = arith.constant 0 : index
    %c0_47 = arith.constant 0 : index
    %115 = vector.load %arg12[%c0_46, %c0_47] : memref<128x128xbf16, #tpu.memory_space<vmem>>, vector<128x128xbf16>
    %cst_48 = arith.constant dense<0.000000e+00> : vector<16x128xf32>
    %116 = tpu.matmul %114, %115, %cst_48 {dimension_numbers = #tpu.dot_dimension_numbers<[1], [0], [0], [1], [0, 0, 1, 1], [], []>} : vector<16x128xbf16>, vector<128x128xbf16>, vector<16x128xf32> -> vector<16x128xf32>
    %c0_49 = arith.constant 0 : index
    %c0_50 = arith.constant 0 : index
    %117 = vector.load %arg13[%c0_49, %c0_50] : memref<1x128xf32, #tpu.memory_space<vmem>>, vector<1x128xf32>
    %118 = vector.broadcast %117 : vector<1x128xf32> to vector<16x128xf32>
    %119 = arith.addf %116, %118 : vector<16x128xf32>
    %120 = arith.addf %1, %119 : vector<16x128xf32>
    %c0_51 = arith.constant 0 : index
    %c0_52 = arith.constant 0 : index
    %c0_53 = arith.constant 0 : index
    %121 = vector.load %arg14[%c0_51, %c0_52, %c0_53] : memref<1x16x128xf32, #tpu.memory_space<vmem>>, vector<1x16x128xf32>
    %122 = vector.shape_cast %121 : vector<1x16x128xf32> to vector<16x128xf32>
    %123 = vector.shape_cast %120 : vector<16x128xf32> to vector<1x16x128xf32>
    tpu.vector_store %arg14[%c0_51, %c0_52, %c0_53], %123 {strides = array<i32>} : memref<1x16x128xf32, #tpu.memory_space<vmem>>, vector<1x16x128xf32>,
    return
  }
  func.func @transform_0(%arg0: i32) -> (i32, i32, i32) {
    %c0_i32 = arith.constant 0 : i32
    %c0_i32_0 = arith.constant 0 : i32
    %c0_i32_1 = arith.constant 0 : i32
    return %arg0, %c0_i32, %c0_i32_0 : i32, i32, i32
  }
  func.func @transform_1(%arg0: i32) -> (i32, i32, i32) {
    %c0_i32 = arith.constant 0 : i32
    %c0_i32_0 = arith.constant 0 : i32
    %c0_i32_1 = arith.constant 0 : i32
    return %arg0, %c0_i32, %c0_i32_0 : i32, i32, i32
  }
  func.func @transform_2(%arg0: i32) -> (i32, i32, i32) {
    %c0_i32 = arith.constant 0 : i32
    %c0_i32_0 = arith.constant 0 : i32
    %c0_i32_1 = arith.constant 0 : i32
    return %arg0, %c0_i32, %c0_i32_0 : i32, i32, i32
  }
  func.func @transform_3(%arg0: i32) -> (i32, i32, i32) {
    %c0_i32 = arith.constant 0 : i32
    %c0_i32_0 = arith.constant 0 : i32
    %c0_i32_1 = arith.constant 0 : i32
    return %arg0, %c0_i32, %c0_i32_0 : i32, i32, i32
  }
  func.func @transform_4(%arg0: i32) -> (i32, i32) {
    %c0_i32 = arith.constant 0 : i32
    %c0_i32_0 = arith.constant 0 : i32
    %c0_i32_1 = arith.constant 0 : i32
    return %c0_i32, %c0_i32_0 : i32, i32
  }
  func.func @transform_5(%arg0: i32) -> (i32, i32) {
    %c0_i32 = arith.constant 0 : i32
    %c0_i32_0 = arith.constant 0 : i32
    %c0_i32_1 = arith.constant 0 : i32
    return %c0_i32, %c0_i32_0 : i32, i32
  }
  func.func @transform_6(%arg0: i32) -> (i32, i32) {
    %c0_i32 = arith.constant 0 : i32
    %c0_i32_0 = arith.constant 0 : i32
    %c0_i32_1 = arith.constant 0 : i32
    return %c0_i32, %c0_i32_0 : i32, i32
  }
  func.func @transform_7(%arg0: i32) -> (i32, i32) {
    %c0_i32 = arith.constant 0 : i32
    %c0_i32_0 = arith.constant 0 : i32
    %c0_i32_1 = arith.constant 0 : i32
    return %c0_i32, %c0_i32_0 : i32, i32
  }
  func.func @transform_8(%arg0: i32) -> (i32, i32) {
    %c0_i32 = arith.constant 0 : i32
    %c0_i32_0 = arith.constant 0 : i32
    %c0_i32_1 = arith.constant 0 : i32
    return %c0_i32, %c0_i32_0 : i32, i32
  }
  func.func @transform_9(%arg0: i32) -> (i32, i32) {
    %c0_i32 = arith.constant 0 : i32
    %c0_i32_0 = arith.constant 0 : i32
    %c0_i32_1 = arith.constant 0 : i32
    return %c0_i32, %c0_i32_0 : i32, i32
  }
  func.func @transform_10(%arg0: i32) -> (i32, i32) {
    %c0_i32 = arith.constant 0 : i32
    %c0_i32_0 = arith.constant 0 : i32
    %c0_i32_1 = arith.constant 0 : i32
    return %c0_i32, %c0_i32_0 : i32, i32
  }
  func.func @transform_11(%arg0: i32) -> (i32, i32) {
    %c0_i32 = arith.constant 0 : i32
    %c0_i32_0 = arith.constant 0 : i32
    %c0_i32_1 = arith.constant 0 : i32
    return %c0_i32, %c0_i32_0 : i32, i32
  }
  func.func @transform_12(%arg0: i32) -> (i32, i32) {
    %c0_i32 = arith.constant 0 : i32
    %c0_i32_0 = arith.constant 0 : i32
    %c0_i32_1 = arith.constant 0 : i32
    return %c0_i32, %c0_i32_0 : i32, i32
  }
  func.func @transform_13(%arg0: i32) -> (i32, i32, i32) {
    %c0_i32 = arith.constant 0 : i32
    %c0_i32_0 = arith.constant 0 : i32
    %c0_i32_1 = arith.constant 0 : i32
    return %arg0, %c0_i32, %c0_i32_0 : i32, i32, i32
  }
}

</mosaic_0001>

<bundles_post_ra>
// kernel: tpu_custom_call.1
= control target key start
LH: loop header
LB: loop body
LE: loop exit
PB: predicated region body
PF: predicated region fallthrough
CT: control target
= control target key end

     0   :  { %s2569_s0 = inlined_call_operand.hbm [shape: f32[2,16,128], index: 0, kind: input, shape index: {}]   ;;  %s2570_s1 = inlined_call_operand.vmem [shape: f32[2,16,1], index: 1, kind: input, shape index: {}]   ;;  %s2571_s2 = inlined_call_operand.vmem [shape: f32[2,1,128], index: 2, kind: input, shape index: {}]   ;;  %s2572_s3 = inlined_call_operand.vmem [shape: f32[2,1,128], index: 3, kind: input, shape index: {}]   ;;  %s2573_s4 = inlined_call_operand.vmem [shape: f32[1,128], index: 4, kind: input, shape index: {}]   ;;  %s2574_s5 = inlined_call_operand.vmem [shape: f32[1,128], index: 5, kind: input, shape index: {}]   ;;  %s2575_s6 = inlined_call_operand.hbm [shape: bf16[128,384], index: 6, kind: input, shape index: {}]   ;;  %s2576_s7 = inlined_call_operand.vmem [shape: f32[1,384], index: 7, kind: input, shape index: {}]   ;;  %s2577_s8 = inlined_call_operand.hbm [shape: f32[128,128], index: 8, kind: input, shape index: {}]   ;;  %s2578_s9 = inlined_call_operand.vmem [shape: f32[1,128], index: 9, kind: input, shape index: {}]   ;;  %s2579_s10 = inlined_call_operand.vmem [shape: f32[1,128], index: 10, kind: input, shape index: {}]   ;;  %s2580_s11 = inlined_call_operand.vmem [shape: bf16[128,128], index: 11, kind: input, shape index: {}]   ;;  %s2581_s12 = inlined_call_operand.vmem [shape: f32[1,128], index: 12, kind: input, shape index: {}]   ;;  %s2582_s13 = inlined_call_operand.hbm [shape: f32[2,16,128], index: 13, kind: output, shape index: {}]  }
   0x1   :  { %2592 = sst [smem:[#allocation14_spill]] %s2572_s3 }
   0x2   :  { %2593 = sst [smem:[#allocation15_spill]] %s2581_s12 }
   0x3   :  { %2594 = sst [smem:[#allocation16_spill]] %s2582_s13 }
   0x4   :  { %18 = vsyncpa [#allocation3], 0 }
   0x5   :  { %20 = vsyncpa [#allocation3 + $0x1], 0 }
   0x6   :  { %21 = vsyncpa [#allocation6], 0 }
   0x7   :  { %22 = vsyncpa [#allocation4], 0 }
   0x8   :  { %24 = vsyncpa [#allocation4 + $0x1], 0  ;;  %s2102_s25 = smov 0   ;;  %s2104_s26 = smov 0  }
   0x9   :  { %s2106_s27 = smov 0   ;;  %s2108_s28 = smov 0  }
   0xa LB: > { %2595 = sst [smem:[#allocation12_spill]] %s2005_s25  ;;  %s2123_s29 = sadd.s32 4294967295, %s2017_s28   ;;  %s2017_s28 = sphi %s2108_s28, %s2625_s28   ;;  %s2013_s27 = sphi %s2106_s27, %s2624_s27   ;;  %s2009_s26 = sphi %s2104_s26, %s2623_s26   ;;  %s2005_s25 = sphi %s2102_s25, %s2622_s25  }
   0xb   : > { %s1494_s30 = sadd.s32 4294967294, %s2017_s28   ;;  %p50_p0 = scmp.ne.s32.totalorder %s2009_s26, %s2005_s25 }
   0xc   : > { %p2585_p1 = scmp.eq.s32.totalorder %s2123_s29, 0  ;;  %p347_p3 = scmp.eq.s32.totalorder %s1494_s30, 1 }
   0xd   : > { %p1495_p5 = scmp.ge.s32.totalorder %s2017_s28, 1  ;;  %p354_p7 = scmp.lt.s32.totalorder %s2017_s28, 3 }
   0xe   : > { %p2132_p4 = por %p2585_p1, %p50_p0  ;;  %p2137_p6 = por %p347_p3, %p50_p0 }
   0xf   : > { %p2142_p8 = pnand %p1495_p5, %p354_p7  ;;  %s2019_s17 = smov [#allocation5]  }
  0x10   : > { %s2596_s14 = scalar_select %p2132_p4, 1, 0 }
  0x11   : > { %s2597_s15 = scalar_select %p2137_p6, 1, 0 }
  0x12   : > { %s372_s18 = sshll.u32 %s2019_s17, 4  ;;  %p1725_p9 = pneg %p2142_p8  ;;  %s2146_s18 = int_to_ptr.vmem [resolvable:$true] %s372_s18 }
  0x13   : > { %2598 = sst [smem:[#allocation13_spill]] %s2597_s15  ;;  %s2020_s20 = smov [#allocation7]  }
  0x14   : > { %p2153_p11 = pnand %p1725_p9, %p2585_p1  ;;  %s388_s21 = sshll.u32 %s2020_s20, 4  ;;  %s2157_s21 = int_to_ptr.vmem [resolvable:$true] %s388_s21 }
  0x15   : > { %s1861_s24 = scalar_lea.hbm %s2575_s6, 3072 }
  0x16   : > { %p1862_p12 = scmp.ne.s32.totalorder %s2575_s6, %s1861_s24  ;;  %p1863_p13 = pneg %p2153_p11 }
  0x17   : > { %p1868_p5 = scmp.lt.u32.totalorder %s1861_s24, %s2575_s6 }
  0x18   : > { %p1864_p0 = pnand %p1863_p13, %p1862_p12 }
  0x1a   : > { %p1865_p3 = pneg %p1864_p0 }
  0x1c   : > { %p1870_p7 = pnand %p1868_p5, %p1865_p3 }
  0x1e   : > { %1873 = shalt.err (!%p1870_p7)
}
  0x1f   : > { %s1874_s20 = scalar_lea.vmem %s2146_s18, 3072  ;;  %p1882_p2 = scmp.lt.s32.totalorder %s2146_s18, %s2146_s18 }
  0x20   : > { %p1875_p9 = scmp.ne.s32.totalorder %s2146_s18, %s1874_s20  ;;  %p1883_p12 = scmp.lt.s32.totalorder %s1874_s20, %s1874_s20 }
  0x22   : > { %p1877_p10 = pnand %p1875_p9, %p1863_p13  ;;  %p1884_p0 = por %p1883_p12, %p1882_p2 }
  0x24   : > { %p1878_p1 = pneg %p1877_p10 }
  0x26   : > { %p1885_p6 = pnand %p1884_p0, %p1878_p1 }
  0x28   : > { %1888 = shalt.err (!%p1885_p6)
}
  0x29   : > { %s2021_s25 = smov 192   ;;  %s2022_s15 = smov 12  }
  0x2a   : > { %1728 = dma.hbm_to_vmem [thread:$0]  (!%p2153_p11), %s2575_s6, 3072, %s2146_s18, [#allocation6], %s2021_s25, %s2021_s25, %s2022_s15  }
  0x2b   : > { %s1889_s17 = scalar_lea.hbm %s2577_s8, 2048 }
  0x2c   : > { %p1890_p2 = scmp.ne.s32.totalorder %s2577_s8, %s1889_s17  ;;  %p1896_p10 = scmp.lt.u32.totalorder %s1889_s17, %s2577_s8 }
  0x2e   : > { %p1892_p1 = pnand %p1890_p2, %p1863_p13 }
  0x30   : > { %p1893_p6 = pneg %p1892_p1 }
  0x32   : > { %p1898_p3 = pnand %p1896_p10, %p1893_p6 }
  0x34   : > { %1901 = shalt.err (!%p1898_p3)
}
  0x35   : > { %s1902_s18 = scalar_lea.vmem %s2157_s21, 2048  ;;  %p1910_p12 = scmp.lt.s32.totalorder %s2157_s21, %s2157_s21 }
  0x36   : > { %p1903_p5 = scmp.ne.s32.totalorder %s2157_s21, %s1902_s18  ;;  %p1911_p0 = scmp.lt.s32.totalorder %s1902_s18, %s1902_s18 }
  0x38   : > { %p1905_p7 = pnand %p1903_p5, %p1863_p13  ;;  %p1912_p2 = por %p1911_p0, %p1910_p12 }
  0x3a   : > { %p1906_p9 = pneg %p1905_p7 }
  0x3c   : > { %p1913_p1 = pnand %p1912_p2, %p1906_p9 }
  0x3e   : > { %1916 = shalt.err (!%p1913_p1)
}
  0x3f   : > { %s2587_s3 = smov 128   ;;  %s2588_s12 = smov 8  }
  0x40   : > { %1731 = dma.hbm_to_vmem [thread:$0]  (!%p2153_p11), %s2577_s8, 2048, %s2157_s21, [#allocation6], %s2587_s3, %s2587_s3, %s2588_s12  }
  0x41   : > { %s2215_s15 = sadd.s32 1, %s2017_s28   ;;  %s37_s23 = sadd.s32 1, %s2013_s27 }
  0x42   : > { %s34_s22 = ssub.s32 %s2017_s28, %s2215_s15  ;;  %p44_p6 = scmp.ne.s32.totalorder %s2013_s27, %s2009_s26 }
  0x43   : > { %p35_p13 = scmp.eq.s32.totalorder %s34_s22, 0  ;;  %p45_p10 = scmp.eq.s32.totalorder %s2017_s28, 0 }
  0x44   : > { %p2601_p5 = scmp.eq.s32.totalorder %s2123_s29, 1  ;;  %p1742_p9 = scmp.lt.s32.totalorder %s2017_s28, 2 }
  0x45   : > { %s2224_s24 = scalar_select %p35_p13, %s2013_s27, %s37_s23  }
  0x46   : > { %p46_p3 = por %p45_p10, %p44_p6  ;;  %p2228_p7 = por %p2601_p5, %p44_p6 }
  0x47   : > { %s414_s30 = sand.u32 1, %s2013_s27   ;;  %s1567_s21 = sshll.u32 %s2017_s28, 8 }
  0x48   : > { %s2602_s19 = scalar_select %p2228_p7, 1, 0 }
  0x49   : > { %s1499_s17 = sshll.u32 %s414_s30, 4  ;;  %s2238_s13 = scalar_lea.hbm %s2569_s0, %s1567_s21 }
  0x4a   : > { %s418_s25 = scalar_lea.vmem [#allocation2], %s1499_s17  ;;  %p2242_p11 = pnand %p1742_p9, %p46_p3 }
  0x4b   : > { %s425_s22 = sshll.u32 %s418_s25, 4  ;;  %s2246_s3 = scalar_lea.sflag [#allocation3], %s414_s30  ;;  %s2240_s22 = int_to_ptr.vmem [resolvable:$true] %s425_s22 }
  0x4c   : > { %s1917_s12 = scalar_lea.hbm %s2238_s13, 256  ;;  %p1919_p0 = pneg %p2242_p11 }
  0x4d   : > { %p1918_p12 = scmp.ne.s32.totalorder %s2238_s13, %s1917_s12  ;;  %s1922_s20 = scalar_lea.hbm %s2569_s0, 512 }
  0x4e   : > { %p1923_p13 = scmp.lt.u32.totalorder %s2238_s13, %s2569_s0  ;;  %p1924_p6 = scmp.lt.u32.totalorder %s1922_s20, %s1917_s12 }
  0x4f   : > { %p1920_p2 = pnand %p1919_p0, %p1918_p12  ;;  %p1926_p3 = scmp.lt.u32.totalorder %s1917_s12, %s2238_s13 }
  0x50   : > { %p1925_p10 = por %p1924_p6, %p1923_p13 }
  0x51   : > { %p1921_p1 = pneg %p1920_p2 }
  0x52   : > { %p1927_p5 = por %p1926_p3, %p1925_p10 }
  0x54   : > { %p1928_p9 = pnand %p1927_p5, %p1921_p1 }
  0x56   : > { %1931 = shalt.err (!%p1928_p9)
}
  0x57   : > { %s1932_s30 = scalar_lea.vmem %s2240_s22, 256  ;;  %s2025_s17 = smov [#allocation2]  }
  0x58   : > { %p1933_p12 = scmp.ne.s32.totalorder %s2240_s22, %s1932_s30  ;;  %s1937_s21 = sshll.u32 %s2025_s17, 4  ;;  %s1938_s21 = int_to_ptr.vmem [resolvable:$false] %s1937_s21 }
  0x59   : > { %s1939_s18 = scalar_lea.vmem %s1938_s21, 512  ;;  %p1940_p4 = scmp.lt.s32.totalorder %s2240_s22, %s1938_s21 }
  0x5a   : > { %p1935_p2 = pnand %p1933_p12, %p1919_p0  ;;  %p1941_p13 = scmp.lt.s32.totalorder %s1939_s18, %s1932_s30 }
  0x5c   : > { %p1936_p7 = pneg %p1935_p2  ;;  %p1942_p6 = por %p1941_p13, %p1940_p4 }
  0x5e   : > { %p1943_p10 = pnand %p1942_p6, %p1936_p7 }
  0x60   : > { %1946 = shalt.err (!%p1943_p10)
}
  0x61   : > { %s2604_s12 = smov 8   ;;  %s2605_s20 = smov 128  }
  0x62   : > { %1735 = dma.hbm_to_vmem [thread:$0]  (!%p2242_p11), %s2238_s13, 256, %s2240_s22, %s2246_s3, %s2605_s20, %s2605_s20, %s2604_s12  }
  0x63   : > { %457 = sbr.rel (%p2142_p8) target bundleno = 1890 (0x762), region = 72  ;;  %s2280_s25 = sand.u32 (!%p2142_p8), 1, %s2009_s26  }
  0x64   : > { %s2591_s30 = sshll.u32 (!%p2142_p8), %s2280_s25, 4  ;;  %s460_s17 = scalar_lea.sflag (!%p2142_p8), [#allocation3], %s2280_s25 }
  0x65   : > { %s463_s23 = scalar_lea.vmem (!%p2142_p8), [#allocation2], %s2591_s30  ;;  %p2606_p4 = scmp.ne.s32.totalorder (!%p2142_p8), %s2596_s14, 0 }
  0x6a   : > { %1992 = dma.done.wait (%p2606_p4), %s460_s17, 256  }
  0x6b   : > { %1994 = vsyncadd (%p2606_p4), %s460_s17, 4294967040  ;;  %p2607_p7 = scmp.eq.s32.totalorder %s2123_s29, 0 }
  0x6d   : > { %1996 = dma.done.wait (%p2607_p7), [#allocation6], 5120   ;;  %p2608_p8 = pmov %p2607_p7 }
  0x6e   : > { %v2294_v0 = vld [vmem:[%s463_s23] sm:$0xff]  ;;  %v2296_v1 = vld [vmem:[%s463_s23 + $0x8] sm:$0xff]  ;;  %v2026_v4 = vmov 0.0   ;;  %v2027_v30 = vmov 0   ;;  %vm2028_vm0 = vmmov 0   ;;  %p525_p11 = scmp.lt.s32.totalorder %s2123_s29, 1  ;;  %v619_v57 = vlaneseq }
  0x6f   : > { %1998 = vsyncadd (%p2608_p8), [#allocation6], 4294962176  ;;  %543 = vadd.xlane.f32.xlu0 %v2294_v0  ;;  %v1791_v2 = vld [vmem:[#allocation5 + $0x4] ss:$12 sps:$4 sm:$0xff]   ;;  %v1793_v3 = vld [vmem:[#allocation5] ss:$12 sps:$4 sm:$0xff]   ;;  %1615 = vmatprep.subr.bf16.mxu1 %v2026_v4 }
  0x70   : > { %v1794_v5 = vld [vmem:[#allocation5 + $0x8] ss:$12 sps:$4 sm:$0xff]   ;;  %762 = vmatprep.subr.bf16.mxu0 %v1791_v2  ;;  %v1797_v15 = vld [vmem:[#allocation5 + $0x18] ss:$12 sps:$4 sm:$0xff]   ;;  %v1798_v16 = vld [vmem:[#allocation5 + $0x20] ss:$12 sps:$4 sm:$0xff]   ;;  %794 = vmatprep.mubr.bf16.mxu0 %v2027_v30 }
  0x71   : > { %v1795_v6 = vld [vmem:[#allocation5 + $0x1c] ss:$12 sps:$4 sm:$0xff]   ;;  %763 = vmatpush1.bf16.msra.mxu0 %v1793_v3  ;;  %1616 = vmatpush3.bf16.msra.mxu1 %v1794_v5  ;;  %v1799_v17 = vld [vmem:[#allocation5 + $0x34] ss:$12 sps:$4 sm:$0xff]   ;;  %v1802_v19 = vld [vmem:[#allocation5 + $0x38] ss:$12 sps:$4 sm:$0xff]  }
  0x72   : > { %764 = vmatprep.subr.bf16.mxu0 %v1795_v6  ;;  %1617 = vmatprep.subr.bf16.mxu1 %v2026_v4  ;;  %v1801_v18 = vld [vmem:[#allocation5 + $0x30] ss:$12 sps:$4 sm:$0xff]   ;;  %v1803_v20 = vld [vmem:[#allocation5 + $0x4c] ss:$12 sps:$4 sm:$0xff]   ;;  %v1805_v21 = vld [vmem:[#allocation5 + $0x48] ss:$12 sps:$4 sm:$0xff]  }
  0x73   : > { %545 = vadd.xlane.f32.xlu0 %v2296_v1  ;;  %v1806_v22 = vld [vmem:[#allocation5 + $0x50] ss:$12 sps:$4 sm:$0xff]   ;;  %v1809_v24 = vld [vmem:[#allocation5 + $0x60] ss:$12 sps:$4 sm:$0xff]   ;;  %v1810_v25 = vld [vmem:[#allocation5 + $0x68] ss:$12 sps:$4 sm:$0xff]   ;;  %1631 = vmatprep.mubr.msk.bf16.mxu1 %vm2028_vm0, %v2026_v4 }
  0x74   : > { %v1807_v23 = vld [vmem:[#allocation5 + $0x64] ss:$12 sps:$4 sm:$0xff]   ;;  %v1811_v26 = vld [vmem:[#allocation5 + $0x7c] ss:$12 sps:$4 sm:$0xff]   ;;  %v1814_v28 = vld [vmem:[#allocation5 + $0x80] ss:$12 sps:$4 sm:$0xff]   ;;  %1789 = vset.pattern.permute.xlu0 %v2027_v30  ;;  %1790 = vset.pattern.permute.xlu1 %v2027_v30 }
  0x75   : > { %765 = vmatpush1.bf16.msra.mxu0 %v1797_v15  ;;  %1618 = vmatpush3.bf16.msra.mxu1 %v1798_v16  ;;  %v1813_v27 = vld [vmem:[#allocation5 + $0x78] ss:$12 sps:$4 sm:$0xff]   ;;  %v1815_v29 = vld [vmem:[#allocation5 + $0x94] ss:$12 sps:$4 sm:$0xff]   ;;  %v1817_v31 = vld [vmem:[#allocation5 + $0x90] ss:$12 sps:$4 sm:$0xff]  }
  0x76   : > { %1619 = vmatprep.subr.bf16.mxu1 %v2026_v4  ;;  %766 = vmatprep.subr.bf16.mxu0 %v1799_v17  ;;  %v1818_v32 = vld [vmem:[#allocation5 + $0x98] ss:$12 sps:$4 sm:$0xff]   ;;  %v1821_v34 = vld [vmem:[#allocation5 + $0xa8] ss:$12 sps:$4 sm:$0xff]   ;;  %v1822_v35 = vld [vmem:[#allocation5 + $0xb0] ss:$12 sps:$4 sm:$0xff]  }
  0x77   : > { %v1819_v33 = vld [vmem:[#allocation5 + $0xac] ss:$12 sps:$4 sm:$0xff]   ;;  %s2323_s14 = scalar_select %p525_p11, %s2123_s29, 1  ;;  %v1509_v48 = vld [vmem:[%s2573_s4] ss:$0 sm:$0xff]  ;;  %v2339_v58 = vshrl.u32 %v619_v57, 7 }
  0x78   : > { %v1510_v52 = vld [vmem:[%s2574_s5] ss:$0 sm:$0xff]  ;;  %v2386_v57 = vld [vmem:[#allocation7 + $0x28] sm:$0xff]  ;;  %vm977_vm8 = vcmask 130048   ;;  %s2613_s18 = sld [smem:[#allocation14_spill]]  ;;  %s2614_s12 = sld [smem:[#allocation15_spill]] }
  0x79   : > { %767 = vmatpush1.bf16.msra.mxu0 %v1801_v18  ;;  %1620 = vmatpush3.bf16.msra.mxu1 %v1802_v19  ;;  %s1568_s16 = sshll.u32 %s2323_s14, 4  ;;  %v621_v59 = vsub.s32 0, %v2339_v58  ;;  %v617_v60 = vld [vmem:[%s2576_s7] sm:$0x7]  ;;  %v625_v61 = vsub.s32 1, %v2339_v58  ;;  %v629_v63 = vsub.s32 2, %v2339_v58  ;;  %s532_s17 = scalar_lea.vmem %s2571_s2, %s2323_s14 }
  0x7a   : > { %1621 = vmatprep.subr.bf16.mxu1 %v2026_v4  ;;  %768 = vmatprep.subr.bf16.mxu0 %v1803_v20  ;;  %s529_s22 = scalar_lea.vmem %s2570_s1, %s1568_s16  ;;  %s2615_s20 = sshll.u32 %s2280_s25, 4 }
  0x7b   : > { %v539_v36 = vld [vmem:[%s529_s22] sm:$0xff]  ;;  %v540_v37 = vld [vmem:[%s529_s22 + $0x8] sm:$0xff]  ;;  %v622_v3 = vrot.slane %v617_v60, %v621_v59  ;;  %v626_v5 = vrot.slane %v617_v60, %v625_v61  ;;  %v630_v6 = vrot.slane %v617_v60, %v629_v63  ;;  %v2391_v61 = vld [vmem:[#allocation7 + $0x30] sm:$0xff]  ;;  %s1569_s16 = sshll.u32 %s2123_s29, 8  ;;  %s2616_s22 = sld [smem:[#allocation16_spill]] }
  0x7c   : > { %vm541_vm1 = vcmp.eq.f32.partialorder %v539_v36, 1.0  ;;  %vm542_vm2 = vcmp.eq.f32.partialorder %v540_v37, 1.0  ;;  %s1359_s29 = scalar_lea.sflag [#allocation4], %s2280_s25  ;;  %p2617_p1 = scmp.ne.s32.totalorder %s2602_s19, 0 }
  0x7d   : > { %769 = vmatpush1.bf16.msra.mxu0 %v1805_v21  ;;  %1622 = vmatpush3.bf16.msra.mxu1 %v1806_v22  ;;  %v846_v38 = vsel %vm541_vm1, 1, %v2027_v30  ;;  %v847_v39 = vsel %vm542_vm2, 1, %v2027_v30 }
  0x7e   : > { %1623 = vmatprep.subr.bf16.mxu1 %v2026_v4  ;;  %770 = vmatprep.subr.bf16.mxu0 %v1807_v23  ;;  %s535_s30 = scalar_lea.vmem %s2613_s18, %s2323_s14 }
  0x81   : > { %771 = vmatpush1.bf16.msra.mxu0 %v1809_v24  ;;  %1624 = vmatpush3.bf16.msra.mxu1 %v1810_v25  ;;  %s2524_s21 = scalar_lea.hbm %s2616_s22, %s1569_s16 }
  0x82   : > { %772 = vmatprep.subr.bf16.mxu0 %v1811_v26  ;;  %1625 = vmatprep.subr.bf16.mxu1 %v2026_v4 }
  0x85   : > { %773 = vmatpush1.bf16.msra.mxu0 %v1813_v27  ;;  %1626 = vmatpush3.bf16.msra.mxu1 %v1814_v28 }
  0x86   : > { %774 = vmatprep.subr.bf16.mxu0 %v1815_v29  ;;  %1627 = vmatprep.subr.bf16.mxu1 %v2026_v4 }
  0x89   : > { %775 = vmatpush1.bf16.msra.mxu0 %v1817_v31  ;;  %1628 = vmatpush3.bf16.msra.mxu1 %v1818_v32 }
  0x8a   : > { %776 = vmatprep.subr.bf16.mxu0 %v1819_v33  ;;  %1629 = vmatprep.subr.bf16.mxu1 %v2026_v4 }
  0x8b   : > { %849 = vperm.xlu0 %1789, %v846_v38  }
  0x8d   : > { %777 = vmatpush1.bf16.msra.mxu0 %v1821_v34  ;;  %1630 = vmatpush3.bf16.msra.mxu1 %v1822_v35 }
  0x8e   : > { %1635 = vmatprep.subr.bf16.mxu0 %v2026_v4 }
  0xfc   : > { %v544_v7 = vpop.xlane.xlu0 %543 }
  0xfd   : > { %v548_v8 = vmul.f32 0.0078125, %v544_v7 }
  0xff   : > { %v2303_v9 = vsub.f32 %v2294_v0, %v548_v8 }
 0x100   : > { %v546_v10 = vpop.xlane.xlu0 %545 }
 0x101   : > { %v549_v11 = vmul.f32 0.0078125, %v546_v10  ;;  %v552_v12 = vmul.f32 %v2303_v9, %v2303_v9 }
 0x103   : > { %v2308_v13 = vsub.f32 %v2296_v1, %v549_v11  ;;  %554 = vadd.xlane.f32.xlu1 %v552_v12 }
 0x105   : > { %v553_v14 = vmul.f32 %v2308_v13, %v2308_v13 }
 0x107   : > { %556 = vadd.xlane.f32.xlu1 %v553_v14 }
 0x10a   : > { %v850_v62 = vpop.permute.xlu0 %849 }
 0x10b   : > { %vm854_vm3 = vcmp.eq.s32.totalorder %v850_v62, 1  ;;  %v2393_v62 = vld [vmem:[#allocation7 + $0x38] sm:$0xff] }
 0x10c   : > { %vm2350_vm5 = vmneg %vm854_vm3  ;;  %v913_v63 = vpack.c.bf16 %v2393_v62, %v2391_v61 }
 0x118   : > { %852 = vperm.xlu1 %1790, %v847_v39  }
 0x190   : > { %v555_v40 = vpop.xlane.xlu1 %554 }
 0x191   : > { %v558_v41 = vmul.f32 0.0078125, %v555_v40 }
 0x193   : > { %v560_v42 = vadd.f32 1e-05, %v558_v41 }
 0x194   : > { %v557_v43 = vpop.xlane.xlu1 %556 }
 0x195   : > { %1831 = vrsqrt.f32 %v560_v42  ;;  %v559_v44 = vmul.f32 0.0078125, %v557_v43 }
 0x197   : > { %v561_v45 = vadd.f32 1e-05, %v559_v44 }
 0x198   : > { %v853_v2 = vpop.permute.xlu1 %852 }
 0x199   : > { %1833 = vrsqrt.f32 %v561_v45  ;;  %vm855_vm4 = vcmp.eq.s32.totalorder %v853_v2, 1  ;;  %v2400_v2 = vld [vmem:[#allocation7 + $0x40] sm:$0xff] }
 0x19a   : > { %vm2357_vm6 = vmneg %vm855_vm4 }
 0x19b   : > { %vm1537_vm7 = vmpackc.low %vm2357_vm6, %vm2350_vm5 }
 0x19f   : > { %v1832_v46 = vpop.eup %1831 }
 0x1a0   : > { %v564_v47 = vmul.f32 %v1832_v46, %v2303_v9  ;;  %v2413_v9 = vld [vmem:[#allocation7 + $0x60] sm:$0xff] }
 0x1a2   : > { %v573_v51 = vmul.f32 %v1509_v48, %v564_v47 }
 0x1a3   : > { %v1834_v49 = vpop.eup %1833 }
 0x1a4   : > { %v565_v50 = vmul.f32 %v1834_v49, %v2308_v13  ;;  %v582_v54 = vadd.f32 %v1510_v52, %v573_v51  ;;  %v2373_v51 = vld [vmem:[#allocation7 + $0x8] sm:$0xff]  ;;  %v2420_v13 = vld [vmem:[#allocation7 + $0x70] sm:$0xff] }
 0x1a6   : > { %v574_v53 = vmul.f32 %v1509_v48, %v565_v50  ;;  %v2371_v50 = vld [vmem:[#allocation7] sm:$0xff] }
 0x1a8   : > { %v583_v55 = vadd.f32 %v1510_v52, %v574_v53  ;;  %v2375_v52 = vld [vmem:[#allocation7 + $0x10] sm:$0xff]  ;;  %v910_v53 = vpack.c.bf16 %v2373_v51, %v2371_v50 }
 0x1aa   : > { %v584_v56 = vpack.c.bf16 %v583_v55, %v582_v54  ;;  %v2379_v54 = vld [vmem:[#allocation7 + $0x18] sm:$0xff] }
 0x1ab   : > { %v911_v55 = vpack.c.bf16 %v2379_v54, %v2375_v52 }
 0x1ac   : > { %795 = vmatmul.mubr.bf16.vlgmr.msra.gmra.mrb[0].mxu0 %v584_v56  ;;  %1632 = vmatmul.mubr.bf16.vlgmr.msra.gmra.mrb[0].mxu1 %v584_v56  ;;  %v2384_v56 = vld [vmem:[#allocation7 + $0x20] sm:$0xff] }
 0x1ad   : > { %1651 = vmatprep.mubr.msk.bf16.mxu0 %vm2028_vm0, %v2026_v4  ;;  %1636 = vmatpush3.bf16.msra.mxu0 %v910_v53  ;;  %v912_v60 = vpack.c.bf16 %v2386_v57, %v2384_v56 }
 0x1ae   : > { %1637 = vmatprep.subr.bf16.mxu0 %v2026_v4 }
 0x1b1   : > { %1638 = vmatpush3.bf16.msra.mxu0 %v911_v55 }
 0x1b2   : > { %1639 = vmatprep.subr.bf16.mxu0 %v2026_v4 }
 0x1b5   : > { %1640 = vmatpush3.bf16.msra.mxu0 %v912_v60 }
 0x1b6   : > { %1641 = vmatprep.subr.bf16.mxu0 %v2026_v4 }
 0x1b9   : > { %1642 = vmatpush3.bf16.msra.mxu0 %v913_v63 }
 0x1ba   : > { %1643 = vmatprep.subr.bf16.mxu0 %v2026_v4 }
 0x27f   : > { %v796_v7 = vpop.f32.mrb[0].mxu0  ;;  %v839_v8 = vpop.f32.mrb[0].mxu1 }
 0x280   : > { %v2354_v10 = vadd.f32 %v796_v7, %v622_v3  ;;  %v798_v11 = vpop.f32.mrb[1].mxu0  ;;  %v1633_v12 = vpop.f32.mrb[1].mxu1  ;;  %v840_v17 = vadd.f32 %v839_v8, %v630_v6  ;;  %v2409_v7 = vld [vmem:[#allocation7 + $0x58] sm:$0xff] }
 0x281   : > { %v799_v14 = vadd.f32 %v798_v11, %v626_v5  ;;  %v800_v15 = vpop.f32.mrb[2].mxu0  ;;  %v842_v16 = vpop.f32.mrb[2].mxu1  ;;  %v2415_v11 = vld [vmem:[#allocation7 + $0x68] sm:$0xff] }
 0x282   : > { %v2361_v18 = vadd.f32 %v800_v15, %v622_v3  ;;  %v843_v19 = vadd.f32 %v842_v16, %v630_v6  ;;  %v802_v20 = vpop.f32.mrb[3].mxu0  ;;  %v1634_v21 = vpop.f32.mrb[3].mxu1  ;;  %883 = vmax.xlane.f32.xlu0 %v2354_v10  ;;  %v2402_v3 = vld [vmem:[#allocation7 + $0x48] sm:$0xff]  ;;  %v2407_v6 = vld [vmem:[#allocation7 + $0x50] sm:$0xff]  ;;  %v916_v12 = vpack.c.bf16 %v2415_v11, %v2413_v9 }
 0x283   : > { %v803_v22 = vadd.f32 %v802_v20, %v626_v5  ;;  %v856_v24 = vsel %vm854_vm3, -inf, %v799_v14  ;;  %v914_v5 = vpack.c.bf16 %v2402_v3, %v2400_v2  ;;  %v915_v8 = vpack.c.bf16 %v2409_v7, %v2407_v6  ;;  %v2422_v14 = vld [vmem:[#allocation7 + $0x78] sm:$0xff] }
 0x284   : > { %v1538_v23 = vpack.c.bf16 %v843_v19, %v840_v17  ;;  %v917_v15 = vpack.c.bf16 %v2422_v14, %v2420_v13 }
 0x285   : > { %v857_v25 = vsel %vm855_vm4, -inf, %v803_v22  ;;  %1644 = vmatpush3.bf16.msra.mxu0 %v914_v5 }
 0x286   : > { %v860_v26 = vmax.f32 %v856_v24, %v857_v25  ;;  %1655 = vmatprep.subr.msk.bf16.mxu1 %vm1537_vm7, %v1538_v23  ;;  %1645 = vmatprep.subr.bf16.mxu0 %v2026_v4 }
 0x287   : > { %1656 = vmatpush3.bf16.msk.msra.mxu1 %vm1537_vm7, %v1538_v23 }
 0x288   : > { %v861_v27 = vrot.slane %v860_v26, 4  ;;  %1673 = vmatprep.subr.bf16.mxu1 %v2026_v4 }
 0x289   : > { %1646 = vmatpush3.bf16.msra.mxu0 %v915_v8 }
 0x28a   : > { %v862_v28 = vmax.f32 %v860_v26, %v861_v27  ;;  %1647 = vmatprep.subr.bf16.mxu0 %v2026_v4 }
 0x28c   : > { %v863_v29 = vrot.slane %v862_v28, 2 }
 0x28d   : > { %1648 = vmatpush3.bf16.msra.mxu0 %v916_v12 }
 0x28e   : > { %v864_v30 = vmax.f32 %v862_v28, %v863_v29  ;;  %1649 = vmatprep.subr.bf16.mxu0 %v2026_v4 }
 0x290   : > { %v865_v31 = vrot.slane %v864_v30, 1 }
 0x291   : > { %1650 = vmatpush3.bf16.msra.mxu0 %v917_v15 }
 0x292   : > { %v866_v32 = vmax.f32 %v864_v30, %v865_v31  ;;  %1693 = vmatprep.subr.bf16.mxu0 %v2026_v4 }
 0x294   : > { %v867_v33 = vsub.f32 %v856_v24, %v866_v32  ;;  %v868_v34 = vsub.f32 %v857_v25, %v866_v32 }
 0x296   : > { %v869_v35 = vmul.f32 1.442695, %v867_v33  ;;  %v871_v36 = vmul.f32 1.442695, %v868_v34 }
 0x298   : > { %1835 = vpow2.f32 %v869_v35 }
 0x299   : > { %1837 = vpow2.f32 %v871_v36 }
 0x2a2   : > { %v1836_v37 = vpop.eup %1835 }
 0x2a3   : > { %v1838_v38 = vpop.eup %1837 }
 0x2a4   : > { %v873_v39 = vadd.f32 %v1838_v38, %v1836_v37 }
 0x2a6   : > { %v874_v40 = vrot.slane %v873_v39, 4 }
 0x2a8   : > { %v875_v41 = vadd.f32 %v874_v40, %v873_v39 }
 0x2aa   : > { %v876_v42 = vrot.slane %v875_v41, 2 }
 0x2ac   : > { %v877_v43 = vadd.f32 %v876_v42, %v875_v41 }
 0x2ae   : > { %v878_v44 = vrot.slane %v877_v43, 1 }
 0x2b0   : > { %v879_v45 = vadd.f32 %v878_v44, %v877_v43 }
 0x2b2   : > { %1839 = vrcp.f32 %v879_v45 }
 0x2bc   : > { %v1840_v46 = vpop.eup %1839 }
 0x2bd   : > { %v881_v47 = vmul.f32 %v1840_v46, %v1836_v37  ;;  %v882_v48 = vmul.f32 %v1840_v46, %v1838_v38 }
 0x2bf   : > { %v959_v49 = vpack.c.bf16 %v882_v48, %v881_v47 }
 0x2c1   : > { %961 = vxpose.xlu1.c.b16.start.end [1/1] (short) %v959_v49, 128 }
 0x2ea   : > { %885 = vmax.xlane.f32.xlu1 %v2361_v18 }
 0x30f   : > { %v884_v25 = vpop.xlane.xlu0 %883 }
 0x310   : > { %v887_v26 = vsub.f32 %v2354_v10, %v884_v25 }
 0x312   : > { %v889_v27 = vmul.f32 1.442695, %v887_v26 }
 0x314   : > { %1841 = vpow2.f32 %v889_v27 }
 0x31e   : > { %v1842_v31 = vpop.eup %1841 }
 0x327   : > { %v969_v16 = vpop.trf.xlu1 }
 0x328   : > { %1657 = vmatprep.mubr.msk.bf16.mxu1 %vm977_vm8, %v969_v16 }
 0x32b   : > { %v970_v17 = vpop.trf.xlu1 }
 0x32c   : > { %1658 = vmatmul.mubr.msk.bf16.vlgmr.msra.gmra.mrb[4].mxu1 %vm977_vm8, %v970_v17 }
 0x32f   : > { %v971_v19 = vpop.trf.xlu1 }
 0x330   : > { %1661 = vmatprep.mubr.msk.bf16.mxu1 %vm977_vm8, %v971_v19 }
 0x333   : > { %v972_v20 = vpop.trf.xlu1 }
 0x334   : > { %1662 = vmatmul.mubr.msk.bf16.gmra.mrb[8].mxu1 %vm977_vm8, %v972_v20 }
 0x337   : > { %v973_v21 = vpop.trf.xlu1 }
 0x338   : > { %1665 = vmatprep.mubr.msk.bf16.mxu1 %vm977_vm8, %v973_v21 }
 0x33b   : > { %v974_v22 = vpop.trf.xlu1 }
 0x33c   : > { %1666 = vmatmul.mubr.msk.bf16.gmra.mrb[12].mxu1 %vm977_vm8, %v974_v22 }
 0x33f   : > { %v975_v23 = vpop.trf.xlu1 }
 0x340   : > { %1669 = vmatprep.mubr.msk.bf16.mxu1 %vm977_vm8, %v975_v23 }
 0x343   : > { %v976_v24 = vpop.trf.xlu1 }
 0x344   : > { %1670 = vmatmul.mubr.msk.bf16.gmra.mrb[16].mxu1 %vm977_vm8, %v976_v24 }
 0x345   : > { %1689 = vmatprep.mubr.msk.bf16.mxu1 %vm2028_vm0, %v2026_v4 }
 0x377   : > { %v886_v28 = vpop.xlane.xlu1 %885 }
 0x378   : > { %v888_v29 = vsub.f32 %v2361_v18, %v886_v28 }
 0x37a   : > { %v891_v30 = vmul.f32 1.442695, %v888_v29 }
 0x37c   : > { %1843 = vpow2.f32 %v891_v30 }
 0x386   : > { %v1844_v32 = vpop.eup %1843 }
 0x387   : > { %v893_v33 = vpack.c.bf16 %v1844_v32, %v1842_v31 }
 0x389   : > { %1652 = vmatmul.mubr.bf16.vlgmr.msra.gmra.mrb[4].mxu0 %v893_v33 }
 0x38a   : > { %1709 = vmatprep.mubr.msk.bf16.mxu0 %vm2028_vm0, %v2026_v4 }
 0x3ff   : > { %v1659_v34 = vpop.f32.mrb[4].mxu1 }
 0x400   : > { %v1036_v35 = vpop.f32.mrb[5].mxu1  ;;  %v1101_v37 = vmul.f32 %v1659_v34, %v2375_v52 }
 0x401   : > { %v1660_v36 = vpop.f32.mrb[6].mxu1  ;;  %v1099_v18 = vmul.f32 %v1036_v35, %v2371_v50  ;;  %v1823_v35 = vld [vmem:[%s2580_s11] sm:$0xff]  }
 0x402   : > { %v1102_v10 = vmul.f32 %v1660_v36, %v2379_v54  ;;  %v1039_v38 = vpop.f32.mrb[7].mxu1  ;;  %1694 = vmatpush3.bf16.msra.mxu0 %v1823_v35  ;;  %v1824_v36 = vld [vmem:[%s2580_s11 + $0x8] sm:$0xff]  }
 0x403   : > { %v1100_v39 = vmul.f32 %v1039_v38, %v2373_v51  ;;  %1695 = vmatprep.subr.bf16.mxu0 %v2026_v4  ;;  %v1827_v38 = vld [vmem:[%s2580_s11 + $0x20] sm:$0xff]  }
 0x404   : > { %v1116_v40 = vpack.c.bf16 %v1102_v10, %v1101_v37  ;;  %v1825_v37 = vld [vmem:[%s2580_s11 + $0x10] sm:$0xff]   ;;  %v1826_v10 = vld [vmem:[%s2580_s11 + $0x18] sm:$0xff]  }
 0x405   : > { %v1115_v41 = vpack.c.bf16 %v1100_v39, %v1099_v18  ;;  %v1828_v18 = vld [vmem:[%s2580_s11 + $0x28] sm:$0xff]   ;;  %v1829_v39 = vld [vmem:[%s2580_s11 + $0x30] sm:$0xff]  }
 0x406   : > { %1696 = vmatpush3.bf16.msra.mxu0 %v1824_v36 }
 0x407   : > { %1674 = vmatpush3.bf16.xpose.msra.mxu1 %v1115_v41  ;;  %v1663_v42 = vpop.f32.mrb[8].mxu1  ;;  %1697 = vmatprep.subr.bf16.mxu0 %v2026_v4 }
 0x408   : > { %v1105_v43 = vmul.f32 %v1663_v42, %v2391_v61  ;;  %v1052_v44 = vpop.f32.mrb[9].mxu1  ;;  %1675 = vmatprep.subr.bf16.mxu1 %v2026_v4 }
 0x409   : > { %v1103_v45 = vmul.f32 %v1052_v44, %v2384_v56  ;;  %v1664_v46 = vpop.f32.mrb[10].mxu1 }
 0x40a   : > { %v1106_v47 = vmul.f32 %v1664_v46, %v2393_v62  ;;  %v1055_v48 = vpop.f32.mrb[11].mxu1  ;;  %1698 = vmatpush3.bf16.msra.mxu0 %v1825_v37 }
 0x40b   : > { %v1104_v49 = vmul.f32 %v1055_v48, %v2386_v57  ;;  %1699 = vmatprep.subr.bf16.mxu0 %v2026_v4 }
 0x40c   : > { %v1118_v50 = vpack.c.bf16 %v1106_v47, %v1105_v43  ;;  %v1208_v47 = vld [vmem:[%s532_s17] sm:$0x1]  ;;  %s524_s17 = scalar_lea.vmem [#allocation8], %s2615_s20 }
 0x40d   : > { %v1117_v52 = vpack.c.bf16 %v1104_v49, %v1103_v45  ;;  %v1209_v48 = vadd.f32 1.0, %v1208_v47  ;;  %s1372_s23 = sshll.u32 %s524_s17, 4  ;;  %s2519_s23 = int_to_ptr.vmem [resolvable:$true] %s1372_s23 }
 0x40e   : > { %1700 = vmatpush3.bf16.msra.mxu0 %v1826_v10  ;;  %s1947_s18 = scalar_lea.vmem %s2519_s23, 256 }
 0x40f   : > { %1676 = vmatpush3.bf16.xpose.msra.mxu1 %v1116_v40  ;;  %v1667_v51 = vpop.f32.mrb[12].mxu1  ;;  %1701 = vmatprep.subr.bf16.mxu0 %v2026_v4  ;;  %v1830_v40 = vld [vmem:[%s2580_s11 + $0x38] sm:$0xff]   ;;  %p1948_p0 = scmp.ne.s32.totalorder %s2519_s23, %s1947_s18 }
 0x410   : > { %1677 = vmatprep.subr.bf16.mxu1 %v2026_v4  ;;  %v1109_v53 = vmul.f32 %v1667_v51, %v2407_v6  ;;  %v1068_v54 = vpop.f32.mrb[13].mxu1  ;;  %v1214_v51 = vrot.slane %v1209_v48, %v621_v59 }
 0x411   : > { %v1107_v55 = vmul.f32 %v1068_v54, %v2400_v2  ;;  %v1668_v60 = vpop.f32.mrb[14].mxu1  ;;  %p1949_p3 = pnand %p1948_p0, %p2617_p1 }
 0x412   : > { %v1110_v56 = vmul.f32 %v1668_v60, %v2409_v7  ;;  %v1071_v61 = vpop.f32.mrb[15].mxu1  ;;  %1702 = vmatpush3.bf16.msra.mxu0 %v1827_v38 }
 0x413   : > { %v1108_v62 = vmul.f32 %v1071_v61, %v2402_v3  ;;  %1703 = vmatprep.subr.bf16.mxu0 %v2026_v4  ;;  %p1950_p5 = pneg %p1949_p3 }
 0x414   : > { %v1120_v63 = vpack.c.bf16 %v1110_v56, %v1109_v53  ;;  %v1550_v56 = vld [vmem:[%s535_s30] ss:$0 sm:$0xff]  ;;  %s2029_s30 = smov [#allocation8]  }
 0x415   : > { %v1119_v5 = vpack.c.bf16 %v1108_v62, %v1107_v55  ;;  %s1951_s14 = sshll.u32 %s2029_s30, 4  ;;  %s1952_s14 = int_to_ptr.vmem [resolvable:$false] %s1951_s14 }
 0x416   : > { %1704 = vmatpush3.bf16.msra.mxu0 %v1828_v18  ;;  %p1954_p9 = scmp.lt.s32.totalorder %s2519_s23, %s1952_s14 }
 0x417   : > { %1678 = vmatpush3.bf16.xpose.msra.mxu1 %v1117_v52  ;;  %v1671_v57 = vpop.f32.mrb[16].mxu1  ;;  %1705 = vmatprep.subr.bf16.mxu0 %v2026_v4  ;;  %v1549_v52 = vld [vmem:[%s2579_s10] ss:$0 sm:$0xff] }
 0x418   : > { %1679 = vmatprep.subr.bf16.mxu1 %v2026_v4  ;;  %v1113_v8 = vmul.f32 %v1671_v57, %v2420_v13  ;;  %v1084_v12 = vpop.f32.mrb[17].mxu1 }
 0x419   : > { %v1111_v6 = vmul.f32 %v1084_v12, %v2413_v9  ;;  %v1672_v15 = vpop.f32.mrb[18].mxu1 }
 0x41a   : > { %v1114_v2 = vmul.f32 %v1672_v15, %v2422_v14  ;;  %v1087_v16 = vpop.f32.mrb[19].mxu1  ;;  %1706 = vmatpush3.bf16.msra.mxu0 %v1829_v39 }
 0x41b   : > { %v1112_v7 = vmul.f32 %v1087_v16, %v2415_v11  ;;  %1707 = vmatprep.subr.bf16.mxu0 %v2026_v4 }
 0x41c   : > { %v1122_v17 = vpack.c.bf16 %v1114_v2, %v1113_v8 }
 0x41d   : > { %v1121_v19 = vpack.c.bf16 %v1112_v7, %v1111_v6 }
 0x41e   : > { %1708 = vmatpush3.bf16.msra.mxu0 %v1830_v40 }
 0x41f   : > { %1680 = vmatpush3.bf16.xpose.msra.mxu1 %v1118_v50 }
 0x420   : > { %1681 = vmatprep.subr.bf16.mxu1 %v2026_v4 }
 0x427   : > { %1682 = vmatpush3.bf16.xpose.msra.mxu1 %v1119_v5 }
 0x428   : > { %1683 = vmatprep.subr.bf16.mxu1 %v2026_v4 }
 0x42f   : > { %1684 = vmatpush3.bf16.xpose.msra.mxu1 %v1120_v63 }
 0x430   : > { %1685 = vmatprep.subr.bf16.mxu1 %v2026_v4 }
 0x437   : > { %1686 = vmatpush3.bf16.xpose.msra.mxu1 %v1121_v19 }
 0x438   : > { %1687 = vmatprep.subr.bf16.mxu1 %v2026_v4  ;;  %v1548_v4 = vld [vmem:[%s2578_s9] ss:$0 sm:$0xff] }
 0x43f   : > { %1688 = vmatpush3.bf16.xpose.msra.mxu1 %v1122_v17 }
 0x446   : > { %1690 = vmatmul.mubr.bf16.vlgmr.msra.gmra.mrb[20].mxu1 %v893_v33 }
 0x45c   : > { %v952_v3 = vpop.f32.mrb[4].mxu0 }
 0x45d   : > { %v1653_v9 = vpop.f32.mrb[5].mxu0  ;;  %1845 = vrcp.f32 %v952_v3 }
 0x45e   : > { %v955_v13 = vpop.f32.mrb[6].mxu0  ;;  %v1553_v9 = vld [vmem:[%s2614_s12] ss:$0 sm:$0xff]  ;;  %s1953_s12 = scalar_lea.vmem %s1952_s14, 512 }
 0x45f   : > { %v1654_v11 = vpop.f32.mrb[7].mxu0  ;;  %1847 = vrcp.f32 %v955_v13  ;;  %p1955_p12 = scmp.lt.s32.totalorder %s1953_s12, %s1947_s18 }
 0x461   : > { %p1956_p2 = por %p1955_p12, %p1954_p9 }
 0x463   : > { %p1957_p13 = pnand %p1956_p2, %p1950_p5 }
 0x467   : > { %v1846_v14 = vpop.eup %1845 }
 0x469   : > { %v1848_v23 = vpop.eup %1847 }
 0x519   : > { %v1157_v20 = vpop.f32.mrb[20].mxu1 }
 0x51a   : > { %v1166_v21 = vmul.f32 %v1846_v14, %v1157_v20  ;;  %v1691_v22 = vpop.f32.mrb[21].mxu1 }
 0x51b   : > { %v1160_v24 = vpop.f32.mrb[22].mxu1 }
 0x51c   : > { %v1167_v25 = vmul.f32 %v1848_v23, %v1160_v24  ;;  %v1692_v26 = vpop.f32.mrb[23].mxu1  ;;  %1168 = vadd.xlane.f32.xlu0 %v1166_v21 }
 0x520   : > { %1170 = vadd.xlane.f32.xlu0 %v1167_v25 }
 0x5a9   : > { %v1169_v27 = vpop.xlane.xlu0 %1168 }
 0x5aa   : > { %v1172_v28 = vmul.f32 0.0078125, %v1169_v27 }
 0x5ac   : > { %v1174_v29 = vsub.f32 %v1166_v21, %v1172_v28 }
 0x5ad   : > { %v1171_v30 = vpop.xlane.xlu0 %1170 }
 0x5ae   : > { %v1173_v31 = vmul.f32 0.0078125, %v1171_v30  ;;  %v1176_v32 = vmul.f32 %v1174_v29, %v1174_v29 }
 0x5b0   : > { %v1175_v33 = vsub.f32 %v1167_v25, %v1173_v31  ;;  %1178 = vadd.xlane.f32.xlu0 %v1176_v32 }
 0x5b2   : > { %v1177_v34 = vmul.f32 %v1175_v33, %v1175_v33 }
 0x5b4   : > { %1180 = vadd.xlane.f32.xlu0 %v1177_v34 }
 0x63d   : > { %v1179_v41 = vpop.xlane.xlu0 %1178 }
 0x63e   : > { %v1182_v42 = vmul.f32 0.0078125, %v1179_v41 }
 0x640   : > { %v1184_v43 = vadd.f32 1e-05, %v1182_v42 }
 0x641   : > { %v1181_v44 = vpop.xlane.xlu0 %1180 }
 0x642   : > { %1849 = vrsqrt.f32 %v1184_v43  ;;  %v1183_v45 = vmul.f32 0.0078125, %v1181_v44 }
 0x644   : > { %v1185_v46 = vadd.f32 1e-05, %v1183_v45 }
 0x646   : > { %1851 = vrsqrt.f32 %v1185_v46 }
 0x64c   : > { %v1850_v49 = vpop.eup %1849 }
 0x64d   : > { %v1188_v50 = vmul.f32 %v1850_v49, %v1174_v29 }
 0x64f   : > { %v1197_v53 = vmul.f32 %v1548_v4, %v1188_v50 }
 0x650   : > { %v1852_v54 = vpop.eup %1851 }
 0x651   : > { %v1189_v55 = vmul.f32 %v1852_v54, %v1175_v33  ;;  %v1206_v60 = vadd.f32 %v1549_v52, %v1197_v53 }
 0x653   : > { %v1198_v61 = vmul.f32 %v1548_v4, %v1189_v55  ;;  %v1216_v62 = vmul.f32 %v1214_v51, %v1206_v60 }
 0x655   : > { %v1207_v63 = vadd.f32 %v1549_v52, %v1198_v61  ;;  %v1225_v5 = vadd.f32 %v1550_v56, %v1216_v62 }
 0x657   : > { %v1217_v57 = vmul.f32 %v1214_v51, %v1207_v63  ;;  %v1551_v8 = vmul.f32 -1.442695, %v1225_v5 }
 0x659   : > { %v1226_v12 = vadd.f32 %v1550_v56, %v1217_v57  ;;  %1853 = vpow2.f32 %v1551_v8 }
 0x65b   : > { %v1552_v6 = vmul.f32 -1.442695, %v1226_v12 }
 0x65d   : > { %1855 = vpow2.f32 %v1552_v6 }
 0x663   : > { %v1854_v15 = vpop.eup %1853 }
 0x664   : > { %v1233_v2 = vadd.f32 1.0, %v1854_v15 }
 0x666   : > { %1857 = vrcp.f32 %v1233_v2 }
 0x667   : > { %v1856_v58 = vpop.eup %1855 }
 0x668   : > { %v1234_v59 = vadd.f32 1.0, %v1856_v58 }
 0x66a   : > { %1859 = vrcp.f32 %v1234_v59 }
 0x670   : > { %v1858_v16 = vpop.eup %1857 }
 0x671   : > { %v1239_v17 = vmul.f32 %v1858_v16, %v1225_v5 }
 0x674   : > { %v1860_v7 = vpop.eup %1859 }
 0x675   : > { %v1240_v19 = vmul.f32 %v1860_v7, %v1226_v12 }
 0x677   : > { %v1241_v3 = vpack.c.bf16 %v1240_v19, %v1239_v17 }
 0x679   : > { %1710 = vmatmul.mubr.bf16.vlgmr.msra.gmra.mrb[8].mxu0 %v1241_v3 }
 0x74c   : > { %v1347_v13 = vpop.f32.mrb[8].mxu0 }
 0x74d   : > { %v1348_v11 = vadd.f32 %v1553_v9, %v1347_v13  ;;  %v1711_v14 = vpop.f32.mrb[9].mxu0 }
 0x74e   : > { %v1350_v20 = vpop.f32.mrb[10].mxu0 }
 0x74f   : > { %v1354_v21 = vadd.f32 %v1348_v11, %v2294_v0  ;;  %v1351_v22 = vadd.f32 %v1553_v9, %v1350_v20  ;;  %v1712_v23 = vpop.f32.mrb[11].mxu0 }
 0x751   : > { %1356 = vst [vmem:[%s524_s17] sm:$0xff] %v1354_v21  ;;  %v1355_v24 = vadd.f32 %v1351_v22, %v2296_v1 }
 0x753   : > { %1357 = vst [vmem:[%s524_s17 + $0x8] sm:$0xff] %v1355_v24 }
 0x754   : > { %1960 = shalt.err (!%p1957_p13)
}
 0x755   : > { %s1961_s20 = scalar_lea.hbm %s2524_s21, 256  ;;  %s1965_s3 = scalar_lea.hbm %s2616_s22, 512 }
 0x756   : > { %p1962_p6 = scmp.ne.s32.totalorder %s2524_s21, %s1961_s20  ;;  %p1966_p7 = scmp.lt.u32.totalorder %s2524_s21, %s2616_s22 }
 0x757   : > { %p1967_p8 = scmp.lt.u32.totalorder %s1965_s3, %s1961_s20  ;;  %p1969_p0 = scmp.lt.u32.totalorder %s1961_s20, %s2524_s21 }
 0x758   : > { %p1963_p10 = pnand %p1962_p6, %p2617_p1 }
 0x759   : > { %p1968_p11 = por %p1967_p8, %p1966_p7 }
 0x75a   : > { %p1964_p4 = pneg %p1963_p10 }
 0x75b   : > { %p1970_p3 = por %p1969_p0, %p1968_p11 }
 0x75d   : > { %p1971_p5 = pnand %p1970_p3, %p1964_p4 }
 0x75f   : > { %1974 = shalt.err (!%p1971_p5)
}
 0x760   : > { %s2030_s18 = smov 128   ;;  %s2031_s14 = smov 8  }
 0x761   : > { %1723 = dma.vmem_to_hbm [thread:$0]  (%p2617_p1), %s2519_s23, 256, %s2524_s21, %s1359_s29, %s2030_s18, %s2030_s18, %s2031_s14  }
 0x762 PF: > { %s2618_s12 = sld [smem:[#allocation12_spill]]  ;;  %s2619_s17 = sld [smem:[#allocation13_spill]] }
 0x763   : > { %p2621_p12 = scmp.ge.s32.totalorder %s2017_s28, 2 }
 0x768   : > { %s1387_s16 = sand.u32 1, %s2618_s12   ;;  %p2620_p9 = scmp.ne.s32.totalorder %s2619_s17, 0 }
 0x769   : > { %s1388_s20 = scalar_lea.sflag [#allocation4], %s1387_s16 }
 0x76a   : > { %p1737_p2 = pnand %p2621_p12, %p2620_p9 }
 0x76c   : > { %2000 = dma.done.wait (!%p1737_p2), %s1388_s20, 256  }
 0x76d   : > { %2002 = vsyncadd (!%p1737_p2), %s1388_s20, 4294967040  ;;  %p27_p13 = scmp.ge.s32.totalorder %s2215_s15, 4   ;;  %s2622_s25 = smov %s2009_s26 }
 0x76e   : > { %s2623_s26 = smov %s2013_s27  ;;  %s2624_s27 = smov %s2224_s24 }
 0x76f   : > { %s2625_s28 = smov %s2215_s15  ;;  %29 = sbr.rel (!%p27_p13) target bundleno = 10 (0xa), region = 134 }
 0x776   :  { %1393 = vsyncpa [#allocation3], 1 }
 0x777   :  { %1395 = vsyncpa [#allocation3 + $0x1], 1 }
 0x778   :  { %1396 = vsyncpa [#allocation6], 1 }
 0x779   :  { %1397 = vsyncpa [#allocation4], 1 }
 0x77a   :  { %1399 = vsyncpa [#allocation4 + $0x1], 1 }

</bundles_post_ra>
